<compile_context>
chip_gen: v7x
topology: tpu7x:2x2x1
jax: 0.10.0
libtpu: 0.0.40
codegen_flags: <defaults>
</compile_context>

<pallas_src>
import functools
import math

import jax
import jax.numpy as jnp
from jax.experimental import pallas as pl
from jax.experimental.pallas import tpu as pltpu

V_TH = 1.0
DECAY = 0.25
_LANES = 128
_SUBLANES = 8  # f32 sublane count; count partials are always f32


def _round_up(x, m):
    return ((x + m - 1) // m) * m


def _cdiv(a, b):
    return (a + b - 1) // b


def _sublane_align(dtype):
    # Sub-32-bit dtypes pack along sublanes: f32 -> 8, bf16 -> 16, int8 -> 32.
    return _SUBLANES * max(1, 4 // jnp.dtype(dtype).itemsize)


def _choose_tiles(R, align, cap):
    """Pick (rows-per-tile, #tiles): align-multiple rows, <= cap, >= 2 tiles when useful."""
    cap = max(align, (cap // align) * align)
    g = max(1, _cdiv(R, cap))
    if R >= 2 * align:
        g = max(g, 2)  # keep both v7x TensorCores busy
    tr = min(cap, _round_up(_cdiv(R, g), align))
    if R >= align:
        tr = min(tr, (R // align) * align)  # never let a block exceed the array dim
    g = _cdiv(R, tr)
    return tr, g


def _make_lif_kernel(R, tr, ragged):
    def kernel(x_ref, o_ref, s_ref, u_ref):
        # x_ref / o_ref : (1, tr, 128) blocks in VMEM
        # s_ref         : (T, 1, 8, 128) per-step spike-count partials, resident across t
        # u_ref         : (tr, 128) f32 scratch, persists across the t grid axis
        t = pl.program_id(1)

        @pl.when(t == 0)
        def _():
            u_ref[...] = jnp.zeros_like(u_ref)

        u = u_ref[...] * DECAY + x_ref[0].astype(jnp.float32)
        fired = u > V_TH                        # threshold compare once (bool)
        o_ref[0] = fired.astype(o_ref.dtype)
        u_ref[...] = jnp.where(fired, 0.0, u)   # hard reset where a spike fired

        spike = fired.astype(jnp.float32)
        if ragged:
            # Last row tile extends past R: exclude the garbage rows from the count
            # (their spike rows are clipped at output writeback, so only counts matter).
            valid = R - pl.program_id(0) * tr
            rows = jax.lax.broadcasted_iota(jnp.int32, spike.shape, 0)
            spike = jnp.where(rows < valid, spike, 0.0)

        # Fold the (tr, 128) spike block down to one (8, 128) vreg of partial counts;
        # rides free VPU/XLU slack in this DMA-bound kernel.
        s_ref[t, 0] = jnp.sum(
            spike.reshape(tr // _SUBLANES, _SUBLANES, _LANES), axis=0)

    return kernel


@functools.partial(jax.jit, static_argnames=("tile_rows", "out_dtype"))
def lif_act_csr_t(x, *, tile_rows=8192, out_dtype=None):
    """LIF forward.

    x: [T, ...] float -> (spikes [T, ...] in out_dtype (default x.dtype),
                          exact per-step spike counts [T] int32).
    """
    T = x.shape[0]
    n = math.prod(x.shape[1:])
    in_dt = jnp.dtype(x.dtype)
    out_dt = jnp.dtype(out_dtype) if out_dtype is not None else in_dt

    align = max(_sublane_align(in_dt), _sublane_align(out_dt))
    R = _cdiv(n, _LANES)
    tr, g = _choose_tiles(R, align, tile_rows)

    aligned = (n % _LANES == 0) and (R >= align)
    x2 = x.reshape(T, n)
    if aligned:
        r_arr = R
        ragged = (g * tr != R)  # handled in-kernel; no pad / output slice copies
    else:
        # TODO(synk): this pad (and the output slice below) materializes a full extra
        # copy of x / spikes; only taken for feature sizes not divisible by 128.
        r_arr = g * tr
        ragged = False
        x2 = jnp.pad(x2, ((0, 0), (0, r_arr * _LANES - n)))  # zeros never spike
    x3 = x2.reshape(T, r_arr, _LANES)

    in_b, out_b = in_dt.itemsize, out_dt.itemsize
    # Pipeline VMEM: 2x in blocks + 2x out blocks + u scratch + resident count block.
    vmem_bytes = (tr * _LANES * (2 * in_b + 2 * out_b + 4)
                  + 2 * T * _SUBLANES * _LANES * 4)
    vmem_limit = min(max(vmem_bytes + (4 << 20), 32 << 20), 100 << 20)

    cost = pl.CostEstimate(
        flops=4 * T * g * tr * _LANES,
        transcendentals=0,
        bytes_accessed=T * g * tr * _LANES * (in_b + out_b)
        + T * g * _SUBLANES * _LANES * 4,
    )

    spikes3, psums = pl.pallas_call(
        _make_lif_kernel(R, tr, ragged),
        out_shape=(
            jax.ShapeDtypeStruct((T, r_arr, _LANES), out_dt),
            jax.ShapeDtypeStruct((T, g, _SUBLANES, _LANES), jnp.float32),
        ),
        grid_spec=pltpu.PrefetchScalarGridSpec(
            num_scalar_prefetch=0,
            grid=(g, T),
            in_specs=[pl.BlockSpec((1, tr, _LANES), lambda i, t: (t, i, 0))],
            out_specs=(
                pl.BlockSpec((1, tr, _LANES), lambda i, t: (t, i, 0)),
                # Resident across t: written back once per row tile, not per step.
                pl.BlockSpec((T, 1, _SUBLANES, _LANES), lambda i, t: (0, i, 0, 0)),
            ),
            scratch_shapes=[pltpu.VMEM((tr, _LANES), jnp.float32)],
        ),
        compiler_params=pltpu.CompilerParams(
            dimension_semantics=("parallel", "arbitrary"),
            vmem_limit_bytes=vmem_limit,
        ),
        cost_estimate=cost,
    )(x3)

    if aligned:
        spikes = spikes3.reshape((T,) + x.shape[1:])
    else:
        spikes = spikes3.reshape(T, r_arr * _LANES)[:, :n].reshape((T,) + x.shape[1:])

    # Exact reduction of the in-kernel partials (each partial <= tr/8, exactly integral).
    counts = jnp.sum(psums.astype(jnp.int32), axis=(1, 2, 3))
    return spikes, counts


def spike_rate(counts, numel_per_step):
    # Equivalent of self.spikes[i] / self.sums[i] for a single forward pass.
    # TODO(synk): cross-call accumulation of spikes/sums (stateful Python lists in the
    # nn.Module) must be carried by the caller across forward passes.
    return counts / numel_per_step


def _reference(x):
    # Reference accumulates u in f32 (matching the kernel); spikes as f32.
    T = x.shape[0]
    xf = x.astype(jnp.float32)
    u = jnp.zeros_like(xf[0])
    outs = []
    for t in range(T):
        u = u * DECAY + xf[t]
        s = (u > V_TH).astype(jnp.float32)
        outs.append(s)
        u = u * (1.0 - s)
    return jnp.stack(outs)


if __name__ == "__main__":
    key = jax.random.PRNGKey(0)
    k0, k1, k2, k3 = jax.random.split(key, 4)

    # Main test: [T, B, C, H, W] as implied by the PyTorch module.
    T, B, C, H, W = 4, 2, 4, 16, 16
    x = jax.random.normal(k0, (T, B, C, H, W), dtype=jnp.float32) * 2.0
    spikes, counts = jax.block_until_ready(lif_act_csr_t(x))
    ref = _reference(x)
    assert spikes.shape == x.shape and spikes.dtype == x.dtype
    assert jnp.array_equal(spikes.astype(jnp.float32), ref), "spike mismatch vs reference"
    assert jnp.array_equal(counts, ref.reshape(T, -1).sum(axis=1).astype(jnp.int32)), "count mismatch"
    _ = jax.block_until_ready(spike_rate(counts, float(x[0].size)))

    # Ragged row-tile path: feature size divisible by 128, rows not divisible by the tile.
    x_r = jax.random.normal(k1, (4, 2, 5, 8, 16), dtype=jnp.float32) * 2.0  # n = 1280, R = 10
    s_r, c_r = jax.block_until_ready(lif_act_csr_t(x_r))
    ref_r = _reference(x_r)
    assert jnp.array_equal(s_r.astype(jnp.float32), ref_r), "ragged-tile spike mismatch"
    assert jnp.array_equal(c_r, ref_r.reshape(4, -1).sum(axis=1).astype(jnp.int32)), "ragged-tile count mismatch"

    # Non-128-multiple feature size exercises the (slow) zero-padding fallback.
    x_p = jax.random.normal(k2, (4, 2, 3, 5, 7), dtype=jnp.float32) * 2.0  # n = 210
    s_p, c_p = jax.block_until_ready(lif_act_csr_t(x_p))
    ref_p = _reference(x_p)
    assert jnp.array_equal(s_p.astype(jnp.float32), ref_p), "padded-path spike mismatch"
    assert jnp.array_equal(c_p, ref_p.reshape(4, -1).sum(axis=1).astype(jnp.int32)), "padded-path count mismatch"

    # Narrow spike dtype (spikes are exactly 0/1, so int8 output is lossless).
    x_b = (jax.random.normal(k3, (4, 2, 4, 16, 16), dtype=jnp.float32) * 2.0).astype(jnp.bfloat16)
    s_b, c_b = jax.block_until_ready(lif_act_csr_t(x_b, out_dtype=jnp.int8))
    ref_b = _reference(x_b)
    assert s_b.dtype == jnp.int8
    assert jnp.array_equal(s_b.astype(jnp.float32), ref_b), "int8-spike mismatch"
    assert jnp.array_equal(c_b, ref_b.reshape(4, -1).sum(axis=1).astype(jnp.int32)), "int8-spike count mismatch"

    print("KERNEL_OK")
</pallas_src>

<mosaic_0001>
module attributes {stable_mosaic.version = 11 : i64} {
  func.func @kernel(%arg0: i32, %arg1: i32, %arg2: memref<1x8x128xf32, #tpu.memory_space<vmem>>, %arg3: memref<1x8x128xf32, #tpu.memory_space<vmem>>, %arg4: memref<4x1x8x128xf32, #tpu.memory_space<vmem>>, %arg5: memref<8x128xf32, #tpu.memory_space<vmem>>) attributes {dimension_semantics = [#tpu.dimension_semantics<parallel>, #tpu.dimension_semantics<arbitrary>], iteration_bounds = array<i64: 2, 4>, scalar_prefetch = 0 : i64, scratch_operands = 1 : i64, tpu.core_type = #tpu.core_type<tc>, window_params = [{transform_indices = @transform_0, window_bounds = array<i64: 1, 8, 128>}, {transform_indices = @transform_1, window_bounds = array<i64: 1, 8, 128>}, {transform_indices = @transform_2, window_bounds = array<i64: 4, 1, 8, 128>}]} {
    %c0_i32 = arith.constant 0 : i32
    %0 = arith.cmpi eq, %arg1, %c0_i32 : i32
    %1 = arith.extui %0 : i1 to i32
    %c0_i32_0 = arith.constant 0 : i32
    %2 = arith.cmpi ne, %1, %c0_i32_0 : i32
    scf.if %2 {
      %cst_16 = arith.constant 0.000000e+00 : f32
      %27 = vector.broadcast %cst_16 : f32 to vector<8x128xf32>
      %c0_17 = arith.constant 0 : index
      %c0_18 = arith.constant 0 : index
      %28 = vector.load %arg5[%c0_17, %c0_18] : memref<8x128xf32, #tpu.memory_space<vmem>>, vector<8x128xf32>
      tpu.vector_store %arg5[%c0_17, %c0_18], %27 {strides = array<i32>} : memref<8x128xf32, #tpu.memory_space<vmem>>, vector<8x128xf32>,
    } else {
    }
    %c0 = arith.constant 0 : index
    %c0_1 = arith.constant 0 : index
    %3 = vector.load %arg5[%c0, %c0_1] : memref<8x128xf32, #tpu.memory_space<vmem>>, vector<8x128xf32>
    %cst = arith.constant 2.500000e-01 : f32
    %4 = vector.broadcast %cst : f32 to vector<8x128xf32>
    %5 = arith.mulf %3, %4 : vector<8x128xf32>
    %c0_2 = arith.constant 0 : index
    %c0_3 = arith.constant 0 : index
    %c0_4 = arith.constant 0 : index
    %6 = vector.load %arg2[%c0_2, %c0_3, %c0_4] : memref<1x8x128xf32, #tpu.memory_space<vmem>>, vector<1x8x128xf32>
    %7 = vector.shape_cast %6 : vector<1x8x128xf32> to vector<8x128xf32>
    %8 = arith.addf %5, %7 : vector<8x128xf32>
    %cst_5 = arith.constant 1.000000e+00 : f32
    %9 = vector.broadcast %cst_5 : f32 to vector<8x128xf32>
    %10 = arith.cmpf ogt, %8, %9 : vector<8x128xf32>
    %11 = arith.extui %10 : vector<8x128xi1> to vector<8x128xi32>
    %12 = arith.sitofp %11 : vector<8x128xi32> to vector<8x128xf32>
    %c0_6 = arith.constant 0 : index
    %c0_7 = arith.constant 0 : index
    %c0_8 = arith.constant 0 : index
    %13 = vector.load %arg3[%c0_6, %c0_7, %c0_8] : memref<1x8x128xf32, #tpu.memory_space<vmem>>, vector<1x8x128xf32>
    %14 = vector.shape_cast %13 : vector<1x8x128xf32> to vector<8x128xf32>
    %15 = vector.shape_cast %12 : vector<8x128xf32> to vector<1x8x128xf32>
    tpu.vector_store %arg3[%c0_6, %c0_7, %c0_8], %15 {strides = array<i32>} : memref<1x8x128xf32, #tpu.memory_space<vmem>>, vector<1x8x128xf32>,
    %cst_9 = arith.constant 0.000000e+00 : f32
    %16 = vector.broadcast %cst_9 : f32 to vector<8x128xf32>
    %17 = arith.select %10, %16, %8 : vector<8x128xi1>, vector<8x128xf32>
    %c0_10 = arith.constant 0 : index
    %c0_11 = arith.constant 0 : index
    %18 = vector.load %arg5[%c0_10, %c0_11] : memref<8x128xf32, #tpu.memory_space<vmem>>, vector<8x128xf32>
    tpu.vector_store %arg5[%c0_10, %c0_11], %17 {strides = array<i32>} : memref<8x128xf32, #tpu.memory_space<vmem>>, vector<8x128xf32>,
    %19 = arith.extui %10 : vector<8x128xi1> to vector<8x128xi32>
    %20 = arith.sitofp %19 : vector<8x128xi32> to vector<8x128xf32>
    %21 = vector.shape_cast %20 : vector<8x128xf32> to vector<1x8x128xf32>
    %cst_12 = arith.constant dense<0.000000e+00> : vector<8x128xf32>
    %22 = vector.multi_reduction <add>, %21, %cst_12 [0] : vector<1x8x128xf32> to vector<8x128xf32>
    %23 = arith.index_cast %arg1 : i32 to index
    %c0_13 = arith.constant 0 : index
    %c0_14 = arith.constant 0 : index
    %c0_15 = arith.constant 0 : index
    %24 = vector.load %arg4[%23, %c0_13, %c0_14, %c0_15] : memref<4x1x8x128xf32, #tpu.memory_space<vmem>>, vector<1x1x8x128xf32>
    %25 = vector.shape_cast %24 : vector<1x1x8x128xf32> to vector<8x128xf32>
    %26 = vector.shape_cast %22 : vector<8x128xf32> to vector<1x1x8x128xf32>
    tpu.vector_store %arg4[%23, %c0_13, %c0_14, %c0_15], %26 {strides = array<i32>} : memref<4x1x8x128xf32, #tpu.memory_space<vmem>>, vector<1x1x8x128xf32>,
    return
  }
  func.func @transform_0(%arg0: i32, %arg1: i32) -> (i32, i32, i32) {
    %c0_i32 = arith.constant 0 : i32
    %c0_i32_0 = arith.constant 0 : i32
    return %arg1, %arg0, %c0_i32 : i32, i32, i32
  }
  func.func @transform_1(%arg0: i32, %arg1: i32) -> (i32, i32, i32) {
    %c0_i32 = arith.constant 0 : i32
    %c0_i32_0 = arith.constant 0 : i32
    return %arg1, %arg0, %c0_i32 : i32, i32, i32
  }
  func.func @transform_2(%arg0: i32, %arg1: i32) -> (i32, i32, i32, i32) {
    %c0_i32 = arith.constant 0 : i32
    %c0_i32_0 = arith.constant 0 : i32
    %c0_i32_1 = arith.constant 0 : i32
    %c0_i32_2 = arith.constant 0 : i32
    return %c0_i32, %arg0, %c0_i32_0, %c0_i32_1 : i32, i32, i32, i32
  }
}

</mosaic_0001>

<bundles_post_ra>
// kernel: lif_act_csr_t.1
= control target key start
LH: loop header
LB: loop body
LE: loop exit
PB: predicated region body
PF: predicated region fallthrough
CT: control target
= control target key end

     0   :  { %s519_s9 = smov 0   ;;  %s521_s10 = smov 0   ;;  %s612_s0 = inlined_call_operand.vmem [shape: f32[4,16,128], index: 0, kind: input, shape index: {}]   ;;  %s613_s1 = inlined_call_operand.vmem [shape: f32[4,16,128], index: 1, kind: output, shape index: {0}]   ;;  %s614_s2 = inlined_call_operand.vmem [shape: f32[4,2,8,128], index: 2, kind: output, shape index: {1}]  }
   0x1   :  { %s523_s11 = smov 0   ;;  %s525_s12 = smov 0  }
   0x2   :  { %s527_s13 = smov 0   ;;  %s529_s14 = smov 0  }
   0x3   :  { %s531_s15 = smov 0  }
   0x4 LB: > { %s22_s16 = sadd.s32 1, %s492_s13  ;;  %s25_s17 = sadd.s32 1, %s496_s14  ;;  %s500_s15 = sphi %s531_s15, %s13_s15   ;;  %s496_s14 = sphi %s529_s14, %s621_s14   ;;  %s492_s13 = sphi %s527_s13, %s620_s13   ;;  %s488_s12 = sphi %s525_s12, %s619_s12   ;;  %s484_s11 = sphi %s523_s11, %s618_s11   ;;  %s480_s10 = sphi %s521_s10, %s617_s10   ;;  %s476_s9 = sphi %s519_s9, %s616_s9  }
   0x5   : > { %p23_p0 = scmp.ge.s32.totalorder %s22_s16, 4  ;;  %s371_s18 = sadd.s32 4294967295, %s500_s15  }
   0x6   : > { %p98_p1 = scmp.ne.s32.totalorder %s480_s10, %s476_s9  ;;  %p99_p2 = scmp.eq.s32.totalorder %s371_s18, 7 }
   0x7   : > { %s623_s16 = smov (%p23_p0, %s22_s16), 0  ;;  %s625_s17 = smov (!%p23_p0, %s25_s17), %s496_s14 }
   0x8   : > { %p375_p3 = scmp.ge.s32.totalorder %s500_s15, 1  ;;  %p27_p4 = scmp.ge.s32.totalorder %s625_s17, 2 }
   0x9   : > { %p134_p5 = scmp.lt.s32.totalorder %s500_s15, 9  ;;  %p561_p6 = por %p99_p2, %p98_p1 }
   0xa   : > { %s627_s17 = smov (%p27_p4, %s625_s17), 0  ;;  %s88_s21 = sadd.s32 1, %s480_s10 }
   0xb   : > { %p135_p7 = pnand %p375_p3, %p134_p5  ;;  %s85_s20 = ssub.s32 %s496_s14, %s627_s17 }
   0xc   : > { %p86_p8 = scmp.eq.s32.totalorder %s85_s20, 0  ;;  %s163_s23 = sand.u32 (!%p135_p7), 1, %s476_s9  }
   0xd   : > { %138 = sbr.rel (%p135_p7) target bundleno = 48 (0x30), region = 24  ;;  %p166_p9 = scmp.lt.s32.totalorder (!%p135_p7), %s484_s11, 3 }
   0xe   : > { %s571_s22 = scalar_select %p86_p8, %s480_s10, %s88_s21  }
   0xf   : > { %s376_s24 = sshll.u32 (!%p135_p7), %s163_s23, 5  ;;  %p168_p10 = scmp.lt.s32.totalorder (!%p135_p7), %s488_s12, 1 }
  0x10   : > { %s165_s8 = scalar_lea.vmem (!%p135_p7), [#allocation3], %s376_s24  ;;  %p381_p11 = scmp.ne.s32.totalorder (!%p135_p7), %s484_s11, 0 }
  0x14   : > { %s167_s25 = scalar_select %p166_p9, %s484_s11, 3 }
  0x15   : > { %s169_s26 = scalar_select %p168_p10, %s488_s12, 1 }
  0x16   : > { %s377_s27 = sshll.u32 %s167_s25, 1  ;;  %185 = sbr.rel (%p381_p11) target bundleno = 29 (0x1d), region = 28  ;;  %v502_v0 = vmov (!%p381_p11), 0.0  }
  0x17   : > { %s171_s28 = sadd.s32 %s377_s27, %s169_s26  ;;  %186 = vst [vmem:[#allocation2] sm:$0xff] (!%p381_p11), %v502_v0 }
  0x18   : > { %s378_s29 = sshll.u32 %s171_s28, 3 }
  0x19   : > { %s173_s4 = scalar_lea.vmem %s612_s0, %s378_s29  ;;  %s181_s7 = scalar_lea.vmem %s613_s1, %s378_s29 }
  0x1d PF: > { %v189_v2 = vld [vmem:[%s173_s4] sm:$0xff]  ;;  %s383_s9 = sshll.u32 %s484_s11, 3  ;;  %v503_v5 = vmov 0.0   ;;  %s385_s20 = sshll.u32 (%p561_p6), %s488_s12, 3 }
  0x1e   : > { %v187_v1 = vld [vmem:[#allocation2] sm:$0xff]  ;;  %s199_s18 = scalar_lea.vmem %s165_s8, %s383_s9 [#allocation3]  ;;  %s220_s11 = scalar_lea.vmem (%p561_p6), %s614_s2, %s385_s20 }
  0x1f   : > { %v188_v3 = vmul.f32 0.25, %v187_v1 }
  0x20   : > { %218 = sbr.rel (!%p561_p6) target bundleno = 48 (0x30), region = 36 }
  0x21   : > { %v190_v4 = vadd.f32 %v189_v2, %v188_v3 }
  0x23   : > { %vm191_vm0 = vcmp.gt.f32.partialorder %v190_v4, 1.0 }
  0x24   : > { %v382_v6 = vsel %vm191_vm0, 1.0, %v503_v5  ;;  %v195_v7 = vsel %vm191_vm0, 0.0, %v190_v4 }
  0x25   : > { %194 = vst [vmem:[%s181_s7] sm:$0xff] %v382_v6  ;;  %196 = vst [vmem:[#allocation2] sm:$0xff] %v195_v7 }
  0x26   : > { %200 = vst [vmem:[%s199_s18] sm:$0xff] %v382_v6 }
  0x2d   : > { %v254_v8 = vld [vmem:[%s165_s8] sm:$0xff]  ;;  %v256_v9 = vld [vmem:[%s165_s8 + $0x8] sm:$0xff]  ;;  %v258_v10 = vld [vmem:[%s165_s8 + $0x10] sm:$0xff] }
  0x2e   : > { %v260_v11 = vld [vmem:[%s165_s8 + $0x18] sm:$0xff]  ;;  %255 = vst [vmem:[%s220_s11] sm:$0xff] %v254_v8  ;;  %257 = vst [vmem:[%s220_s11 + $0x10] sm:$0xff] %v256_v9 }
  0x2f   : > { %259 = vst [vmem:[%s220_s11 + $0x20] sm:$0xff] %v258_v10  ;;  %261 = vst [vmem:[%s220_s11 + $0x30] sm:$0xff] %v260_v11 }
  0x30 PF: > { %s13_s15 = sadd.s32 1, %s500_s15   ;;  %s616_s9 = smov %s480_s10 }
  0x31   : > { %p10_p12 = scmp.ge.s32.totalorder %s13_s15, 10   ;;  %s617_s10 = smov %s571_s22 }
  0x32   : > { %s618_s11 = smov %s492_s13  ;;  %s619_s12 = smov %s496_s14 }
  0x33   : > { %s620_s13 = smov %s623_s16  ;;  %s621_s14 = smov %s627_s17 }
  0x34   :  { %12 = sbr.rel (!%p10_p12) target bundleno = 4 (0x4), region = 109 }

</bundles_post_ra>
